<compile_context>
chip_gen: v7x
topology: tpu7x:2x2x1
jax: 0.10.0
libtpu: 0.0.40
codegen_flags: <defaults>
</compile_context>

<pallas_src>
import jax
import jax.numpy as jnp
from jax.experimental import pallas as pl
from jax.experimental.pallas import tpu as pltpu


def _round_up(n, m):
    return ((n + m - 1) // m) * m


def mlp_kernel(x_ref, w1_ref, b1_ref, w2_ref, b2_ref, w3_ref, b3_ref, o_ref):
    # One (TILE_B, F) batch tile; all three matmuls fused, weights resident.
    x = x_ref[...]
    h1 = jnp.dot(x, w1_ref[...], preferred_element_type=jnp.float32) + b1_ref[...]
    h1 = jnp.maximum(h1, 0.0)                      # f32 bias add + ReLU (v5e-safe)
    h2 = jnp.dot(h1.astype(w2_ref.dtype), w2_ref[...],
                 preferred_element_type=jnp.float32) + b2_ref[...]
    h2 = jnp.maximum(h2, 0.0)
    out = jnp.dot(h2.astype(w3_ref.dtype), w3_ref[...],
                  preferred_element_type=jnp.float32) + b3_ref[...]
    o_ref[...] = out.astype(o_ref.dtype)


def classifier_forward(x, params, *, tile_b=1024, use_bf16=False):
    """y = relu(relu(x@W1+b1)@W2+b2)@W3+b3, streamed over the batch."""
    w1, b1, w2, b2, w3, b3 = params
    B, F = x.shape
    N = w3.shape[1]

    if use_bf16:
        # bf16 matmul operands halve x's HBM traffic (v6e/v7x MXU is
        # bf16-native); accumulation and all elementwise math stay f32.
        x = x.astype(jnp.bfloat16)
        w1, w2, w3 = (w.astype(jnp.bfloat16) for w in (w1, w2, w3))

    # Large batch tile to amortize the ~0.35 us/grid-step overhead and the
    # masked (TILE_B, 5) stores; never larger than the (sublane-padded) batch.
    tb = min(tile_b, _round_up(B, 8))
    b_pad = _round_up(B, tb)
    if b_pad != B:
        x = jnp.pad(x, ((0, b_pad - B), (0, 0)))

    # Constant index_map => weights/biases are fetched once and stay resident.
    def resident(arr):
        return pl.BlockSpec(arr.shape, lambda i: (0, 0))

    out = pl.pallas_call(
        mlp_kernel,
        out_shape=jax.ShapeDtypeStruct((b_pad, N), jnp.float32),
        grid=(b_pad // tb,),
        in_specs=[
            pl.BlockSpec((tb, F), lambda i: (i, 0)),   # streamed batch tile
            resident(w1), resident(b1),
            resident(w2), resident(b2),
            resident(w3), resident(b3),
        ],
        out_specs=pl.BlockSpec((tb, N), lambda i: (i, 0)),
        compiler_params=pltpu.CompilerParams(
            dimension_semantics=("parallel",),   # use both TCs on v7x
            vmem_limit_bytes=32 * 1024 * 1024,   # portable across v5e/v6e/v7x
        ),
    )(x, w1, b1, w2, b2, w3, b3)
    return out[:B]


def init_params(key):
    # Deterministic synthetic init mimicking PyTorch's default Linear init:
    # U(-1/sqrt(fan_in), 1/sqrt(fan_in)) for weights and biases.
    dims = [(10, 16), (16, 32), (32, 5)]
    params = []
    for (fan_in, fan_out) in dims:
        key, kw, kb = jax.random.split(key, 3)
        bound = 1.0 / jnp.sqrt(jnp.float32(fan_in))
        w = jax.random.uniform(kw, (fan_in, fan_out), jnp.float32, -bound, bound)
        b = jax.random.uniform(kb, (1, fan_out), jnp.float32, -bound, bound)
        params += [w, b]
    return tuple(params)


def reference_forward(x, params):
    w1, b1, w2, b2, w3, b3 = params
    h1 = jnp.maximum(x @ w1 + b1, 0.0)
    h2 = jnp.maximum(h1 @ w2 + b2, 0.0)
    return h2 @ w3 + b3


if __name__ == "__main__":
    key = jax.random.PRNGKey(0)
    key, kx = jax.random.split(key)

    B = 256  # small demo batch; with tile_b=128 this exercises a 2-step grid
    x = jax.random.normal(kx, (B, 10), jnp.float32)
    params = init_params(key)
    ref = reference_forward(x, params)

    # f32 path: exact match vs reference.
    out = jax.block_until_ready(classifier_forward(x, params, tile_b=128))
    assert out.shape == (B, 5), out.shape
    assert jnp.allclose(out, ref, atol=1e-5, rtol=1e-5), "f32 mismatch vs reference"

    # bf16-operand path (v6e/v7x HBM-traffic optimization), f32 accumulation.
    out_bf16 = jax.block_until_ready(
        classifier_forward(x, params, tile_b=128, use_bf16=True))
    assert out_bf16.shape == (B, 5), out_bf16.shape
    assert jnp.allclose(out_bf16, ref, atol=1e-1, rtol=1e-1), "bf16 mismatch vs reference"

    print("KERNEL_OK")
</pallas_src>

<mosaic_0001>
module attributes {stable_mosaic.version = 11 : i64} {
  func.func @mlp_kernel(%arg0: i32, %arg1: memref<128x10xf32, #tpu.memory_space<vmem>>, %arg2: memref<10x16xf32, #tpu.memory_space<vmem>>, %arg3: memref<1x16xf32, #tpu.memory_space<vmem>>, %arg4: memref<16x32xf32, #tpu.memory_space<vmem>>, %arg5: memref<1x32xf32, #tpu.memory_space<vmem>>, %arg6: memref<32x5xf32, #tpu.memory_space<vmem>>, %arg7: memref<1x5xf32, #tpu.memory_space<vmem>>, %arg8: memref<128x5xf32, #tpu.memory_space<vmem>>) attributes {dimension_semantics = [#tpu.dimension_semantics<parallel>], iteration_bounds = array<i64: 2>, scalar_prefetch = 0 : i64, scratch_operands = 0 : i64, tpu.core_type = #tpu.core_type<tc>, window_params = [{transform_indices = @transform_0, window_bounds = array<i64: 128, 10>}, {pipeline_mode = #tpu.pipeline_mode<synchronous>, transform_indices = @transform_1, window_bounds = array<i64: 10, 16>}, {pipeline_mode = #tpu.pipeline_mode<synchronous>, transform_indices = @transform_2, window_bounds = array<i64: 1, 16>}, {pipeline_mode = #tpu.pipeline_mode<synchronous>, transform_indices = @transform_3, window_bounds = array<i64: 16, 32>}, {pipeline_mode = #tpu.pipeline_mode<synchronous>, transform_indices = @transform_4, window_bounds = array<i64: 1, 32>}, {pipeline_mode = #tpu.pipeline_mode<synchronous>, transform_indices = @transform_5, window_bounds = array<i64: 32, 5>}, {pipeline_mode = #tpu.pipeline_mode<synchronous>, transform_indices = @transform_6, window_bounds = array<i64: 1, 5>}, {transform_indices = @transform_7, window_bounds = array<i64: 128, 5>}]} {
    %c0 = arith.constant 0 : index
    %c0_0 = arith.constant 0 : index
    %0 = vector.load %arg1[%c0, %c0_0] : memref<128x10xf32, #tpu.memory_space<vmem>>, vector<128x10xf32>
    %c0_1 = arith.constant 0 : index
    %c0_2 = arith.constant 0 : index
    %1 = vector.load %arg2[%c0_1, %c0_2] : memref<10x16xf32, #tpu.memory_space<vmem>>, vector<10x16xf32>
    %cst = arith.constant dense<0.000000e+00> : vector<128x16xf32>
    %2 = tpu.matmul %0, %1, %cst {dimension_numbers = #tpu.dot_dimension_numbers<[1], [0], [0], [1], [0, 0, 1, 1], [], []>} : vector<128x10xf32>, vector<10x16xf32>, vector<128x16xf32> -> vector<128x16xf32>
    %c0_3 = arith.constant 0 : index
    %c0_4 = arith.constant 0 : index
    %3 = vector.load %arg3[%c0_3, %c0_4] : memref<1x16xf32, #tpu.memory_space<vmem>>, vector<1x16xf32>
    %4 = vector.broadcast %3 : vector<1x16xf32> to vector<128x16xf32>
    %5 = arith.addf %2, %4 : vector<128x16xf32>
    %cst_5 = arith.constant 0.000000e+00 : f32
    %6 = vector.broadcast %cst_5 : f32 to vector<128x16xf32>
    %7 = arith.maximumf %5, %6 : vector<128x16xf32>
    %c0_6 = arith.constant 0 : index
    %c0_7 = arith.constant 0 : index
    %8 = vector.load %arg4[%c0_6, %c0_7] : memref<16x32xf32, #tpu.memory_space<vmem>>, vector<16x32xf32>
    %cst_8 = arith.constant dense<0.000000e+00> : vector<128x32xf32>
    %9 = tpu.matmul %7, %8, %cst_8 {dimension_numbers = #tpu.dot_dimension_numbers<[1], [0], [0], [1], [0, 0, 1, 1], [], []>} : vector<128x16xf32>, vector<16x32xf32>, vector<128x32xf32> -> vector<128x32xf32>
    %c0_9 = arith.constant 0 : index
    %c0_10 = arith.constant 0 : index
    %10 = vector.load %arg5[%c0_9, %c0_10] : memref<1x32xf32, #tpu.memory_space<vmem>>, vector<1x32xf32>
    %11 = vector.broadcast %10 : vector<1x32xf32> to vector<128x32xf32>
    %12 = arith.addf %9, %11 : vector<128x32xf32>
    %cst_11 = arith.constant 0.000000e+00 : f32
    %13 = vector.broadcast %cst_11 : f32 to vector<128x32xf32>
    %14 = arith.maximumf %12, %13 : vector<128x32xf32>
    %c0_12 = arith.constant 0 : index
    %c0_13 = arith.constant 0 : index
    %15 = vector.load %arg6[%c0_12, %c0_13] : memref<32x5xf32, #tpu.memory_space<vmem>>, vector<32x5xf32>
    %cst_14 = arith.constant dense<0.000000e+00> : vector<128x5xf32>
    %16 = tpu.matmul %14, %15, %cst_14 {dimension_numbers = #tpu.dot_dimension_numbers<[1], [0], [0], [1], [0, 0, 1, 1], [], []>} : vector<128x32xf32>, vector<32x5xf32>, vector<128x5xf32> -> vector<128x5xf32>
    %c0_15 = arith.constant 0 : index
    %c0_16 = arith.constant 0 : index
    %17 = vector.load %arg7[%c0_15, %c0_16] : memref<1x5xf32, #tpu.memory_space<vmem>>, vector<1x5xf32>
    %18 = vector.broadcast %17 : vector<1x5xf32> to vector<128x5xf32>
    %19 = arith.addf %16, %18 : vector<128x5xf32>
    %c0_17 = arith.constant 0 : index
    %c0_18 = arith.constant 0 : index
    %20 = vector.load %arg8[%c0_17, %c0_18] : memref<128x5xf32, #tpu.memory_space<vmem>>, vector<128x5xf32>
    tpu.vector_store %arg8[%c0_17, %c0_18], %19 {strides = array<i32>} : memref<128x5xf32, #tpu.memory_space<vmem>>, vector<128x5xf32>,
    return
  }
  func.func @transform_0(%arg0: i32) -> (i32, i32) {
    %c0_i32 = arith.constant 0 : i32
    %c0_i32_0 = arith.constant 0 : i32
    return %arg0, %c0_i32 : i32, i32
  }
  func.func @transform_1(%arg0: i32) -> (i32, i32) {
    %c0_i32 = arith.constant 0 : i32
    %c0_i32_0 = arith.constant 0 : i32
    %c0_i32_1 = arith.constant 0 : i32
    return %c0_i32, %c0_i32_0 : i32, i32
  }
  func.func @transform_2(%arg0: i32) -> (i32, i32) {
    %c0_i32 = arith.constant 0 : i32
    %c0_i32_0 = arith.constant 0 : i32
    %c0_i32_1 = arith.constant 0 : i32
    return %c0_i32, %c0_i32_0 : i32, i32
  }
  func.func @transform_3(%arg0: i32) -> (i32, i32) {
    %c0_i32 = arith.constant 0 : i32
    %c0_i32_0 = arith.constant 0 : i32
    %c0_i32_1 = arith.constant 0 : i32
    return %c0_i32, %c0_i32_0 : i32, i32
  }
  func.func @transform_4(%arg0: i32) -> (i32, i32) {
    %c0_i32 = arith.constant 0 : i32
    %c0_i32_0 = arith.constant 0 : i32
    %c0_i32_1 = arith.constant 0 : i32
    return %c0_i32, %c0_i32_0 : i32, i32
  }
  func.func @transform_5(%arg0: i32) -> (i32, i32) {
    %c0_i32 = arith.constant 0 : i32
    %c0_i32_0 = arith.constant 0 : i32
    %c0_i32_1 = arith.constant 0 : i32
    return %c0_i32, %c0_i32_0 : i32, i32
  }
  func.func @transform_6(%arg0: i32) -> (i32, i32) {
    %c0_i32 = arith.constant 0 : i32
    %c0_i32_0 = arith.constant 0 : i32
    %c0_i32_1 = arith.constant 0 : i32
    return %c0_i32, %c0_i32_0 : i32, i32
  }
  func.func @transform_7(%arg0: i32) -> (i32, i32) {
    %c0_i32 = arith.constant 0 : i32
    %c0_i32_0 = arith.constant 0 : i32
    return %arg0, %c0_i32 : i32, i32
  }
}

</mosaic_0001>

<bundles_post_ra>
// kernel: tpu_custom_call.1
= control target key start
LH: loop header
LB: loop body
LE: loop exit
PB: predicated region body
PF: predicated region fallthrough
CT: control target
= control target key end

     0   :  { %s1303_s24 = smov 0   ;;  %s1460_s0 = inlined_call_operand.vmem [shape: f32[256,10], index: 0, kind: input, shape index: {}]   ;;  %s1461_s1 = inlined_call_operand.vmem [shape: f32[10,16], index: 1, kind: input, shape index: {}]   ;;  %s1462_s2 = inlined_call_operand.vmem [shape: f32[1,16], index: 2, kind: input, shape index: {}]   ;;  %s1463_s3 = inlined_call_operand.vmem [shape: f32[16,32], index: 3, kind: input, shape index: {}]   ;;  %s1464_s4 = inlined_call_operand.vmem [shape: f32[1,32], index: 4, kind: input, shape index: {}]   ;;  %s1465_s5 = inlined_call_operand.vmem [shape: f32[32,5], index: 5, kind: input, shape index: {}]   ;;  %s1466_s6 = inlined_call_operand.vmem [shape: f32[1,5], index: 6, kind: input, shape index: {}]   ;;  %s1467_s7 = inlined_call_operand.vmem [shape: f32[256,5], index: 7, kind: output, shape index: {}]  }
   0x1 LB: > { %s1018_s25 = sadd.s32 4294967295, %s1260_s24   ;;  %p1022_p0 = scmp.ge.s32.totalorder %s1260_s24, 1  ;;  %s1260_s24 = sphi %s1303_s24, %s17_s24  }
   0x2   : > { %p238_p1 = scmp.lt.s32.totalorder %s1260_s24, 3 }
   0x4   : > { %p239_p2 = pnand %p1022_p0, %p238_p1 }
   0x5   : > { %v298_v0 = vld [vmem:[%s1461_s1] sm:$0xff] (!%p239_p2)  ;;  %v299_v1 = vld [vmem:[%s1461_s1 + $0x8] sm:$0x3] (!%p239_p2)  ;;  %vm356_vm0 = vcmask (!%p239_p2), 1041408   ;;  %s1023_s30 = sshll.u32 (!%p239_p2), %s1018_s25, 4  ;;  %vm1262_vm1 = vmmov (!%p239_p2), 1  }
   0x6   : > { %242 = sbr.rel (%p239_p2) target bundleno = 698 (0x2ba), region = 48  ;;  %v1225_v2 = vpack.c.bf16 (!%p239_p2), %v299_v1, %v298_v0  ;;  %vm1226_vm2 = vmpackc.low (!%p239_p2), %vm356_vm0, %vm1262_vm1  ;;  %p271_p3 = scmp.lt.s32.totalorder (!%p239_p2), %s1023_s30, 31  ;;  %v521_v3 = vld [vmem:[%s1463_s3] sm:$0xff] (!%p239_p2)  ;;  %v522_v4 = vld [vmem:[%s1463_s3 + $0x8] sm:$0xff] (!%p239_p2)  ;;  %vm307_vm3 = vcmask (!%p239_p2), 80896   ;;  %vm530_vm4 = vcmask (!%p239_p2), 130048  }
   0x7   : > { %v1231_v5 = vpack.c.bf16 (!%p239_p2), %v522_v4, %v521_v3  ;;  %v740_v22 = vld [vmem:[%s1465_s5] sm:$0xff] (!%p239_p2)  ;;  %v741_v23 = vld [vmem:[%s1465_s5 + $0x8] sm:$0xff] (!%p239_p2)  ;;  %v742_v24 = vld [vmem:[%s1465_s5 + $0x10] sm:$0xff] (!%p239_p2)  ;;  %vm751_vm5 = vcmask (!%p239_p2), 261120   ;;  %vm945_vm6 = vcmask (!%p239_p2), 39936  }
   0x8   : > { %1227 = vmatprep.subr.msk.bf16.mxu0 (!%p239_p2), %vm1226_vm2, %v1225_v2  ;;  %1243 = vmatprep.subr.msk.bf16.mxu1 (!%p239_p2), %vm1226_vm2, %v1225_v2  ;;  %v1235_v25 = vpack.c.bf16 (!%p239_p2), %v741_v23, %v740_v22  ;;  %v743_v26 = vld [vmem:[%s1465_s5 + $0x18] sm:$0xff] (!%p239_p2)  ;;  %v1027_v28 = vld [vmem:[%s1462_s2] ss:$0 sm:$0xff] (!%p239_p2) }
   0x9   : > { %1230 = vmatpush3.bf16.msk.msra.mxu0 (!%p239_p2), %vm1226_vm2, %v1225_v2  ;;  %1244 = vmatpush3.bf16.msk.msra.mxu1 (!%p239_p2), %vm1226_vm2, %v1225_v2  ;;  %v1239_v27 = vpack.c.bf16 (!%p239_p2), %v743_v26, %v742_v24 }
   0xa   : > { %1232 = vmatprep.subr.bf16.mxu1 (!%p239_p2), %v1231_v5  ;;  %1236 = vmatprep.subr.bf16.mxu0 (!%p239_p2), %v1235_v25 }
   0xd   : > { %s1469_s30 = smov (!%p271_p3, %s1023_s30), 31 }
   0xe   : > { %s1024_s12 = sshll.u32 %s1469_s30, 3 }
   0xf   : > { %s1331_s15 = scalar_lea.vmem %s1460_s0, %s1024_s12  ;;  %s1423_s11 = scalar_lea.vmem %s1467_s7, %s1024_s12 }
  0x10   : > { %v282_v6 = vld [vmem:[%s1331_s15] sm:$0xff]  ;;  %v283_v7 = vld [vmem:[%s1331_s15 + $0x8] sm:$0xff]  ;;  %v284_v8 = vld [vmem:[%s1331_s15 + $0x10] sm:$0xff] }
  0x11   : > { %1141 = vmatprep.mubr.msk.f32.mxu0 %vm307_vm3, %v282_v6  ;;  %v290_v9 = vld [vmem:[%s1331_s15 + $0x40] sm:$0xff]  ;;  %v285_v10 = vld [vmem:[%s1331_s15 + $0x18] sm:$0xff]  ;;  %v291_v11 = vld [vmem:[%s1331_s15 + $0x48] sm:$0xff] }
  0x12   : > { %1142 = vmatmul.mubr.msk.f32.vlgmr.msra.gmra.mrb[0].mxu0 %vm307_vm3, %v283_v7  ;;  %1153 = vmatprep.mubr.msk.f32.mxu1 %vm307_vm3, %v290_v9  ;;  %v292_v12 = vld [vmem:[%s1331_s15 + $0x50] sm:$0xff]  ;;  %v286_v13 = vld [vmem:[%s1331_s15 + $0x20] sm:$0xff]  ;;  %v293_v14 = vld [vmem:[%s1331_s15 + $0x58] sm:$0xff] }
  0x13   : > { %1144 = vmatprep.mubr.msk.f32.mxu0 %vm307_vm3, %v284_v8  ;;  %1154 = vmatmul.mubr.msk.f32.vlgmr.msra.gmra.mrb[0].mxu1 %vm307_vm3, %v291_v11  ;;  %v294_v15 = vld [vmem:[%s1331_s15 + $0x60] sm:$0xff]  ;;  %v287_v16 = vld [vmem:[%s1331_s15 + $0x28] sm:$0xff]  ;;  %v288_v17 = vld [vmem:[%s1331_s15 + $0x30] sm:$0xff] }
  0x14   : > { %1156 = vmatprep.mubr.msk.f32.mxu1 %vm307_vm3, %v292_v12  ;;  %1234 = vmatpush3.bf16.msra.mxu1 %v1231_v5  ;;  %v295_v18 = vld [vmem:[%s1331_s15 + $0x68] sm:$0xff]  ;;  %v296_v19 = vld [vmem:[%s1331_s15 + $0x70] sm:$0xff]  ;;  %v289_v20 = vld [vmem:[%s1331_s15 + $0x38] sm:$0xff] }
  0x15   : > { %v297_v21 = vld [vmem:[%s1331_s15 + $0x78] sm:$0xff]  ;;  %1238 = vmatpush3.bf16.msra.mxu0 %v1235_v25 }
  0x16   : > { %1145 = vmatmul.mubr.msk.f32.gmra.mrb[2].mxu0 %vm307_vm3, %v285_v10  ;;  %1240 = vmatprep.subr.bf16.mxu0 %v1239_v27 }
  0x17   : > { %1147 = vmatprep.mubr.msk.f32.mxu0 %vm307_vm3, %v286_v13  ;;  %1157 = vmatmul.mubr.msk.f32.gmra.mrb[2].mxu1 %vm307_vm3, %v293_v14  ;;  %v1045_v13 = vld [vmem:[%s1464_s4] ss:$0 sm:$0xff] }
  0x18   : > { %1159 = vmatprep.mubr.msk.f32.mxu1 %vm307_vm3, %v294_v15 }
  0x19   : > { %1242 = vmatpush3.bf16.msra.mxu0 %v1239_v27 }
  0x1a   : > { %1148 = vmatmul.mubr.msk.f32.gmra.mrb[4].mxu0 %vm307_vm3, %v287_v16 }
  0x1b   : > { %1150 = vmatprep.mubr.msk.f32.mxu0 %vm307_vm3, %v288_v17  ;;  %1160 = vmatmul.mubr.msk.f32.gmra.mrb[4].mxu1 %vm307_vm3, %v295_v18 }
  0x1c   : > { %1162 = vmatprep.mubr.msk.f32.mxu1 %vm307_vm3, %v296_v19 }
  0x1e   : > { %1151 = vmatmul.mubr.msk.f32.gmra.mrb[6].mxu0 %vm307_vm3, %v289_v20 }
  0x1f   : > { %1163 = vmatmul.mubr.msk.f32.gmra.mrb[6].mxu1 %vm307_vm3, %v297_v21 }
  0xe5   : > { %v1143_v29 = vpop.f32.mrb[0].mxu0 }
  0xe6   : > { %v432_v30 = vadd.f32 %v1143_v29, %v1027_v28  ;;  %v426_v31 = vpop.f32.mrb[1].mxu0  ;;  %v1155_v33 = vpop.f32.mrb[0].mxu1 }
  0xe7   : > { %v427_v32 = vadd.f32 %v1027_v28, %v426_v31  ;;  %v466_v34 = vpop.f32.mrb[1].mxu1  ;;  %v472_v0 = vadd.f32 %v1155_v33, %v1027_v28 }
  0xe8   : > { %v506_v37 = vmax.f32 %v432_v30, 0.0  ;;  %v467_v53 = vadd.f32 %v1027_v28, %v466_v34 }
  0xe9   : > { %v505_v35 = vmax.f32 %v427_v32, 0.0  ;;  %v1146_v36 = vpop.f32.mrb[2].mxu0  ;;  %v514_v3 = vmax.f32 %v472_v0, 0.0 }
  0xea   : > { %v442_v38 = vadd.f32 %v1146_v36, %v1027_v28  ;;  %v436_v39 = vpop.f32.mrb[3].mxu0  ;;  %v1158_v41 = vpop.f32.mrb[2].mxu1  ;;  %v513_v61 = vmax.f32 %v467_v53, 0.0 }
  0xeb   : > { %v437_v40 = vadd.f32 %v1027_v28, %v436_v39  ;;  %1169 = vmatprep.mubr.msk.f32.mxu1 %vm530_vm4, %v505_v35  ;;  %v476_v42 = vpop.f32.mrb[3].mxu1  ;;  %v482_v4 = vadd.f32 %v1158_v41, %v1027_v28 }
  0xec   : > { %1170 = vmatmul.mubr.msk.f32.vlgmr.msra.gmra.mrb[8].mxu1 %vm530_vm4, %v506_v37  ;;  %v508_v45 = vmax.f32 %v442_v38, 0.0  ;;  %v477_v62 = vadd.f32 %v1027_v28, %v476_v42 }
  0xed   : > { %v507_v43 = vmax.f32 %v437_v40, 0.0  ;;  %v1149_v44 = vpop.f32.mrb[4].mxu0  ;;  %v516_v7 = vmax.f32 %v482_v4, 0.0 }
  0xee   : > { %v452_v46 = vadd.f32 %v1149_v44, %v1027_v28  ;;  %v446_v47 = vpop.f32.mrb[5].mxu0  ;;  %v1161_v49 = vpop.f32.mrb[4].mxu1  ;;  %v515_v1 = vmax.f32 %v477_v62, 0.0  ;;  %v1062_v62 = vld [vmem:[%s1466_s6] ss:$0 sm:$0xff] }
  0xef   : > { %v447_v48 = vadd.f32 %v1027_v28, %v446_v47  ;;  %1172 = vmatprep.mubr.msk.f32.mxu1 %vm530_vm4, %v507_v43  ;;  %v486_v50 = vpop.f32.mrb[5].mxu1  ;;  %v492_v8 = vadd.f32 %v1161_v49, %v1027_v28 }
  0xf0   : > { %1173 = vmatmul.mubr.msk.f32.gmra.mrb[10].mxu1 %vm530_vm4, %v508_v45  ;;  %v510_v54 = vmax.f32 %v452_v46, 0.0  ;;  %v487_v2 = vadd.f32 %v1027_v28, %v486_v50 }
  0xf1   : > { %v509_v51 = vmax.f32 %v447_v48, 0.0  ;;  %v1152_v52 = vpop.f32.mrb[6].mxu0  ;;  %v518_v10 = vmax.f32 %v492_v8, 0.0 }
  0xf2   : > { %v462_v55 = vadd.f32 %v1152_v52, %v1027_v28  ;;  %v456_v56 = vpop.f32.mrb[7].mxu0  ;;  %v1164_v58 = vpop.f32.mrb[6].mxu1  ;;  %v517_v5 = vmax.f32 %v487_v2, 0.0 }
  0xf3   : > { %v457_v57 = vadd.f32 %v1027_v28, %v456_v56  ;;  %1175 = vmatprep.mubr.msk.f32.mxu1 %vm530_vm4, %v509_v51  ;;  %v496_v59 = vpop.f32.mrb[7].mxu1  ;;  %v502_v11 = vadd.f32 %v1164_v58, %v1027_v28 }
  0xf4   : > { %1176 = vmatmul.mubr.msk.f32.gmra.mrb[12].mxu1 %vm530_vm4, %v510_v54  ;;  %v512_v63 = vmax.f32 %v462_v55, 0.0  ;;  %v497_v6 = vadd.f32 %v1027_v28, %v496_v59 }
  0xf5   : > { %v511_v60 = vmax.f32 %v457_v57, 0.0  ;;  %v520_v12 = vmax.f32 %v502_v11, 0.0 }
  0xf6   : > { %v519_v9 = vmax.f32 %v497_v6, 0.0 }
  0xf7   : > { %1178 = vmatprep.mubr.msk.f32.mxu1 %vm530_vm4, %v511_v60 }
  0xf8   : > { %1179 = vmatmul.mubr.msk.f32.gmra.mrb[14].mxu1 %vm530_vm4, %v512_v63 }
  0xf9   : > { %1181 = vmatprep.mubr.msk.f32.mxu1 %vm530_vm4, %v513_v61 }
  0xfc   : > { %1182 = vmatmul.mubr.msk.f32.gmra.mrb[16].mxu1 %vm530_vm4, %v514_v3 }
  0xfd   : > { %1184 = vmatprep.mubr.msk.f32.mxu1 %vm530_vm4, %v515_v1 }
 0x100   : > { %1185 = vmatmul.mubr.msk.f32.gmra.mrb[18].mxu1 %vm530_vm4, %v516_v7 }
 0x101   : > { %1187 = vmatprep.mubr.msk.f32.mxu1 %vm530_vm4, %v517_v5 }
 0x104   : > { %1188 = vmatmul.mubr.msk.f32.gmra.mrb[20].mxu1 %vm530_vm4, %v518_v10 }
 0x105   : > { %1190 = vmatprep.mubr.msk.f32.mxu1 %vm530_vm4, %v519_v9 }
 0x108   : > { %1191 = vmatmul.mubr.msk.f32.gmra.mrb[22].mxu1 %vm530_vm4, %v520_v12 }
 0x1bf   : > { %v1171_v14 = vpop.f32.mrb[8].mxu1 }
 0x1c0   : > { %v651_v15 = vadd.f32 %v1171_v14, %v1045_v13  ;;  %v645_v16 = vpop.f32.mrb[9].mxu1 }
 0x1c1   : > { %v646_v17 = vadd.f32 %v1045_v13, %v645_v16 }
 0x1c2   : > { %v725_v20 = vmax.f32 %v651_v15, 0.0 }
 0x1c3   : > { %v724_v18 = vmax.f32 %v646_v17, 0.0  ;;  %v1174_v19 = vpop.f32.mrb[10].mxu1 }
 0x1c4   : > { %v661_v21 = vadd.f32 %v1174_v19, %v1045_v13  ;;  %v655_v22 = vpop.f32.mrb[11].mxu1 }
 0x1c5   : > { %v656_v23 = vadd.f32 %v1045_v13, %v655_v22  ;;  %1201 = vmatprep.mubr.msk.f32.mxu0 %vm751_vm5, %v724_v18 }
 0x1c6   : > { %1202 = vmatmul.mubr.msk.f32.vlgmr.msra.gmra.mrb[8].mxu0 %vm751_vm5, %v725_v20  ;;  %v727_v26 = vmax.f32 %v661_v21, 0.0 }
 0x1c7   : > { %v726_v24 = vmax.f32 %v656_v23, 0.0  ;;  %v1177_v25 = vpop.f32.mrb[12].mxu1 }
 0x1c8   : > { %v671_v27 = vadd.f32 %v1177_v25, %v1045_v13  ;;  %v665_v28 = vpop.f32.mrb[13].mxu1 }
 0x1c9   : > { %v666_v29 = vadd.f32 %v1045_v13, %v665_v28  ;;  %1204 = vmatprep.mubr.msk.f32.mxu0 %vm751_vm5, %v726_v24 }
 0x1ca   : > { %1205 = vmatmul.mubr.msk.f32.gmra.mrb[10].mxu0 %vm751_vm5, %v727_v26  ;;  %v729_v32 = vmax.f32 %v671_v27, 0.0 }
 0x1cb   : > { %v728_v30 = vmax.f32 %v666_v29, 0.0  ;;  %v1180_v31 = vpop.f32.mrb[14].mxu1 }
 0x1cc   : > { %v681_v33 = vadd.f32 %v1180_v31, %v1045_v13  ;;  %v675_v34 = vpop.f32.mrb[15].mxu1 }
 0x1cd   : > { %v676_v35 = vadd.f32 %v1045_v13, %v675_v34  ;;  %1207 = vmatprep.mubr.msk.f32.mxu0 %vm751_vm5, %v728_v30 }
 0x1ce   : > { %1208 = vmatmul.mubr.msk.f32.gmra.mrb[12].mxu0 %vm751_vm5, %v729_v32  ;;  %v731_v38 = vmax.f32 %v681_v33, 0.0 }
 0x1cf   : > { %v730_v36 = vmax.f32 %v676_v35, 0.0  ;;  %v1183_v37 = vpop.f32.mrb[16].mxu1 }
 0x1d0   : > { %v691_v39 = vadd.f32 %v1183_v37, %v1045_v13  ;;  %v685_v40 = vpop.f32.mrb[17].mxu1 }
 0x1d1   : > { %v686_v41 = vadd.f32 %v1045_v13, %v685_v40  ;;  %1210 = vmatprep.mubr.msk.f32.mxu0 %vm751_vm5, %v730_v36 }
 0x1d2   : > { %1211 = vmatmul.mubr.msk.f32.gmra.mrb[14].mxu0 %vm751_vm5, %v731_v38  ;;  %v733_v44 = vmax.f32 %v691_v39, 0.0 }
 0x1d3   : > { %v732_v42 = vmax.f32 %v686_v41, 0.0  ;;  %v1186_v43 = vpop.f32.mrb[18].mxu1 }
 0x1d4   : > { %v701_v45 = vadd.f32 %v1186_v43, %v1045_v13  ;;  %v695_v46 = vpop.f32.mrb[19].mxu1 }
 0x1d5   : > { %v696_v47 = vadd.f32 %v1045_v13, %v695_v46  ;;  %1213 = vmatprep.mubr.msk.f32.mxu0 %vm751_vm5, %v732_v42 }
 0x1d6   : > { %1214 = vmatmul.mubr.msk.f32.gmra.mrb[16].mxu0 %vm751_vm5, %v733_v44  ;;  %v735_v50 = vmax.f32 %v701_v45, 0.0 }
 0x1d7   : > { %v734_v48 = vmax.f32 %v696_v47, 0.0  ;;  %v1189_v49 = vpop.f32.mrb[20].mxu1 }
 0x1d8   : > { %v711_v51 = vadd.f32 %v1189_v49, %v1045_v13  ;;  %v705_v52 = vpop.f32.mrb[21].mxu1 }
 0x1d9   : > { %v706_v53 = vadd.f32 %v1045_v13, %v705_v52  ;;  %1216 = vmatprep.mubr.msk.f32.mxu0 %vm751_vm5, %v734_v48 }
 0x1da   : > { %1217 = vmatmul.mubr.msk.f32.gmra.mrb[18].mxu0 %vm751_vm5, %v735_v50  ;;  %v737_v56 = vmax.f32 %v711_v51, 0.0 }
 0x1db   : > { %v736_v54 = vmax.f32 %v706_v53, 0.0  ;;  %v1192_v55 = vpop.f32.mrb[22].mxu1 }
 0x1dc   : > { %v721_v57 = vadd.f32 %v1192_v55, %v1045_v13  ;;  %v715_v58 = vpop.f32.mrb[23].mxu1 }
 0x1dd   : > { %v716_v59 = vadd.f32 %v1045_v13, %v715_v58  ;;  %1219 = vmatprep.mubr.msk.f32.mxu0 %vm751_vm5, %v736_v54 }
 0x1de   : > { %1220 = vmatmul.mubr.msk.f32.gmra.mrb[20].mxu0 %vm751_vm5, %v737_v56  ;;  %v739_v61 = vmax.f32 %v721_v57, 0.0 }
 0x1df   : > { %v738_v60 = vmax.f32 %v716_v59, 0.0 }
 0x1e1   : > { %1222 = vmatprep.mubr.msk.f32.mxu0 %vm751_vm5, %v738_v60 }
 0x1e2   : > { %1223 = vmatmul.mubr.msk.f32.gmra.mrb[22].mxu0 %vm751_vm5, %v739_v61 }
 0x299   : > { %v1203_v63 = vpop.f32.mrb[8].mxu0 }
 0x29a   : > { %v872_v0 = vadd.f32 %v1203_v63, %v1062_v62  ;;  %v866_v1 = vpop.f32.mrb[9].mxu0 }
 0x29b   : > { %v867_v2 = vadd.f32 %v1062_v62, %v866_v1 }
 0x29c   : > { %947 = vst.msk [vmem:[%s1423_s11 + $0x8] sm:$0xff] %vm945_vm6, %v872_v0 }
 0x29d   : > { %946 = vst.msk [vmem:[%s1423_s11] sm:$0xff] %vm945_vm6, %v867_v2  ;;  %v1206_v3 = vpop.f32.mrb[10].mxu0 }
 0x29e   : > { %v882_v4 = vadd.f32 %v1206_v3, %v1062_v62  ;;  %v876_v5 = vpop.f32.mrb[11].mxu0 }
 0x29f   : > { %v877_v6 = vadd.f32 %v1062_v62, %v876_v5 }
 0x2a0   : > { %949 = vst.msk [vmem:[%s1423_s11 + $0x18] sm:$0xff] %vm945_vm6, %v882_v4 }
 0x2a1   : > { %948 = vst.msk [vmem:[%s1423_s11 + $0x10] sm:$0xff] %vm945_vm6, %v877_v6  ;;  %v1209_v7 = vpop.f32.mrb[12].mxu0 }
 0x2a2   : > { %v892_v8 = vadd.f32 %v1209_v7, %v1062_v62  ;;  %v886_v9 = vpop.f32.mrb[13].mxu0 }
 0x2a3   : > { %v887_v10 = vadd.f32 %v1062_v62, %v886_v9 }
 0x2a4   : > { %951 = vst.msk [vmem:[%s1423_s11 + $0x28] sm:$0xff] %vm945_vm6, %v892_v8 }
 0x2a5   : > { %950 = vst.msk [vmem:[%s1423_s11 + $0x20] sm:$0xff] %vm945_vm6, %v887_v10  ;;  %v1212_v11 = vpop.f32.mrb[14].mxu0 }
 0x2a6   : > { %v902_v12 = vadd.f32 %v1212_v11, %v1062_v62  ;;  %v896_v13 = vpop.f32.mrb[15].mxu0 }
 0x2a7   : > { %v897_v14 = vadd.f32 %v1062_v62, %v896_v13 }
 0x2a8   : > { %953 = vst.msk [vmem:[%s1423_s11 + $0x38] sm:$0xff] %vm945_vm6, %v902_v12 }
 0x2a9   : > { %952 = vst.msk [vmem:[%s1423_s11 + $0x30] sm:$0xff] %vm945_vm6, %v897_v14  ;;  %v1215_v15 = vpop.f32.mrb[16].mxu0 }
 0x2aa   : > { %v912_v16 = vadd.f32 %v1215_v15, %v1062_v62  ;;  %v906_v17 = vpop.f32.mrb[17].mxu0 }
 0x2ab   : > { %v907_v18 = vadd.f32 %v1062_v62, %v906_v17 }
 0x2ac   : > { %955 = vst.msk [vmem:[%s1423_s11 + $0x48] sm:$0xff] %vm945_vm6, %v912_v16 }
 0x2ad   : > { %954 = vst.msk [vmem:[%s1423_s11 + $0x40] sm:$0xff] %vm945_vm6, %v907_v18  ;;  %v1218_v19 = vpop.f32.mrb[18].mxu0 }
 0x2ae   : > { %v922_v20 = vadd.f32 %v1218_v19, %v1062_v62  ;;  %v916_v21 = vpop.f32.mrb[19].mxu0 }
 0x2af   : > { %v917_v22 = vadd.f32 %v1062_v62, %v916_v21 }
 0x2b0   : > { %957 = vst.msk [vmem:[%s1423_s11 + $0x58] sm:$0xff] %vm945_vm6, %v922_v20 }
 0x2b1   : > { %956 = vst.msk [vmem:[%s1423_s11 + $0x50] sm:$0xff] %vm945_vm6, %v917_v22  ;;  %v1221_v23 = vpop.f32.mrb[20].mxu0 }
 0x2b2   : > { %v932_v24 = vadd.f32 %v1221_v23, %v1062_v62  ;;  %v926_v25 = vpop.f32.mrb[21].mxu0 }
 0x2b3   : > { %v927_v26 = vadd.f32 %v1062_v62, %v926_v25 }
 0x2b4   : > { %959 = vst.msk [vmem:[%s1423_s11 + $0x68] sm:$0xff] %vm945_vm6, %v932_v24 }
 0x2b5   : > { %958 = vst.msk [vmem:[%s1423_s11 + $0x60] sm:$0xff] %vm945_vm6, %v927_v26  ;;  %v1224_v27 = vpop.f32.mrb[22].mxu0 }
 0x2b6   : > { %v942_v28 = vadd.f32 %v1224_v27, %v1062_v62  ;;  %v936_v29 = vpop.f32.mrb[23].mxu0 }
 0x2b7   : > { %v937_v30 = vadd.f32 %v1062_v62, %v936_v29 }
 0x2b8   : > { %961 = vst.msk [vmem:[%s1423_s11 + $0x78] sm:$0xff] %vm945_vm6, %v942_v28 }
 0x2b9   : > { %960 = vst.msk [vmem:[%s1423_s11 + $0x70] sm:$0xff] %vm945_vm6, %v937_v30 }
 0x2ba PF: > { %s17_s24 = sadd.s32 1, %s1260_s24  }
 0x2bb   : > { %p14_p4 = scmp.ge.s32.totalorder %s17_s24, 4  }
 0x2bd   :  { %16 = sbr.rel (!%p14_p4) target bundleno = 1 (0x1), region = 78 }

</bundles_post_ra>
